<compile_context>
chip_gen: v7x
topology: tpu7x:2x2x1
jax: 0.10.0
libtpu: 0.0.40
codegen_flags: <defaults>
</compile_context>

<pallas_src>
import jax
import jax.numpy as jnp
from jax.experimental import pallas as pl
from jax.experimental.pallas import tpu as pltpu


def _round_up(x, m):
    return ((x + m - 1) // m) * m


def _vmem_capacity_bytes():
    try:
        info = pltpu.get_tpu_info()
        cap = getattr(info, "vmem_capacity_bytes", None)
        if cap:
            return int(cap)
    except Exception:
        pass
    return 64 * 1024 * 1024  # conservative (v7x-sized) fallback


def _num_tensorcores():
    """2 on multi-TensorCore chips (v7x / megacore), 1 on v5e/v6e."""
    try:
        info = pltpu.get_tpu_info()
        for name in ("num_cores", "core_count", "num_tensorcores",
                     "tensorcores_per_chip"):
            n = getattr(info, name, None)
            if isinstance(n, int) and n >= 1:
                return max(1, min(int(n), 2))
    except Exception:
        pass
    try:
        kind = jax.devices()[0].device_kind.lower()
        if "v7" in kind or "7x" in kind:
            return 2
    except Exception:
        pass
    return 1


def _make_nll_kernel(tm, steps, n_rows, needs_mask):
    def kernel(y_ref, t_ref, out_ref, acc_ref):
        c = pl.program_id(0)           # core / "parallel" axis
        i = pl.program_id(1)           # reduction steps within this core

        @pl.when(i == 0)
        def _():
            acc_ref[...] = jnp.zeros_like(acc_ref)

        # (tm, V) log-probs; bf16 inputs are upcast here (free under the DMA,
        # and v5e's VPU has no bf16 compare/select anyway).
        logp = y_ref[...].astype(jnp.float32)
        tgt = t_ref[...]                                    # (tm, 1) int32

        # one-hot select via lane iota + where (no cast/mul on the hot path)
        col = jax.lax.broadcasted_iota(jnp.int32, logp.shape, 1)
        hit = col == tgt
        if needs_mask:
            # mask rows beyond the logical end of the (unpadded) input; this
            # also neutralizes garbage read from partial boundary blocks.
            row = jax.lax.broadcasted_iota(jnp.int32, logp.shape, 0)
            base = (c * steps + i) * tm
            hit = hit & ((row + base) < n_rows)
        masked = jnp.where(hit, logp, 0.0)

        # lane reduce -> sublane reduce -> single-vreg accumulator
        row_sums = jnp.sum(masked, axis=-1, keepdims=True)          # (tm, 1)
        acc_ref[...] += jnp.sum(row_sums, axis=0, keepdims=True)    # (1, 1)

        @pl.when(i == pl.num_programs(1) - 1)
        def _():
            out_ref[...] = (-acc_ref[...]).astype(out_ref.dtype)

    return kernel


def loss_fun(y_model, y_true, reduction='sum'):
    """Pallas equivalent of LossFun.forward.

    y_model: (B, T, V) float32/bfloat16 log-probabilities (as from log_softmax).
    y_true:  (B, T)    int class indices.
    """
    if reduction not in ('sum', 'mean'):
        raise ValueError('Reduction could be either `sum` or `mean`.')

    B, T, V = y_model.shape
    BT = B * T

    # Keep f32/bf16 inputs as-is (a wrapper-side astype would materialize a
    # full HBM copy of the dominant tensor).
    if y_model.dtype not in (jnp.float32, jnp.bfloat16):
        y_model = y_model.astype(jnp.float32)
    y_flat = y_model.reshape(BT, V)
    t_flat = y_true.reshape(BT, 1).astype(jnp.int32)

    itemsize = y_flat.dtype.itemsize
    V_pad = _round_up(V, 128)                 # lane padding inside VMEM

    vmem_cap = _vmem_capacity_bytes()
    n_cores = _num_tensorcores()

    # ---- row-tile selection -------------------------------------------------
    # VMEM per row: double-buffered y tile + double-buffered (tm,1) target
    # tile (lane-padded to 128 lanes, i.e. 512 B/row).
    per_row_vmem = 2 * V_pad * itemsize + 2 * 128 * 4
    buf_budget = min(int(0.55 * vmem_cap), 40 * 1024 * 1024)
    tm = buf_budget // per_row_vmem
    tm = max(16, min(8192, (tm // 16) * 16))   # multiple of 16 for bf16 packing

    rows_per_core = -(-BT // n_cores)
    tm = min(tm, max(16, _round_up(rows_per_core, 16)))
    steps = -(-rows_per_core // tm)
    # never let a grid point index a block that is fully out of bounds
    if n_cores > 1 and (n_cores * steps - 1) * tm >= BT:
        n_cores = 1
        steps = -(-BT // tm)

    needs_mask = (n_cores * steps * tm) != BT

    # ---- VMEM limit (accounting includes 128-lane padding) ------------------
    est = (2 * tm * V_pad * itemsize          # double-buffered log-prob tiles
           + 2 * tm * 128 * 4                 # double-buffered (tm,1) targets
           + 8 * 128 * 4)                     # (1,1) accumulator vreg
    vmem_limit = min(int(0.78 * vmem_cap), max(32 * 1024 * 1024, est + (12 << 20)))
    vmem_limit = max(vmem_limit, est + (2 << 20))

    kernel = _make_nll_kernel(tm, steps, BT, needs_mask)

    out = pl.pallas_call(
        kernel,
        out_shape=jax.ShapeDtypeStruct((n_cores, 1), jnp.float32),
        grid_spec=pltpu.PrefetchScalarGridSpec(
            num_scalar_prefetch=0,
            grid=(n_cores, steps),
            in_specs=[
                pl.BlockSpec((tm, V), lambda c, i: (c * steps + i, 0)),
                pl.BlockSpec((tm, 1), lambda c, i: (c * steps + i, 0)),
            ],
            out_specs=pl.BlockSpec((1, 1), lambda c, i: (c, 0)),
            scratch_shapes=[pltpu.VMEM((1, 1), jnp.float32)],
        ),
        compiler_params=pltpu.CompilerParams(
            dimension_semantics=("parallel", "arbitrary"),
            vmem_limit_bytes=int(vmem_limit)),
    )(y_flat, t_flat)

    total = jnp.sum(out)
    if reduction == 'sum':
        return total
    # mean over batch of per-sequence (sum over T) losses == total / B
    return total / jnp.float32(B)


def _reference(y_model, y_true, reduction='sum'):
    B, T, V = y_model.shape
    y_flat = y_model.reshape(B * T, V)
    t_flat = y_true.reshape(B * T)
    loss_matrix = -jnp.take_along_axis(y_flat, t_flat[:, None], axis=1)[:, 0]
    if reduction == 'sum':
        return jnp.sum(loss_matrix)
    return jnp.mean(jnp.sum(loss_matrix.reshape(B, T), axis=1))


if __name__ == "__main__":
    key = jax.random.PRNGKey(0)

    # case 1: friendly shape
    B, T, V = 2, 8, 32
    k1, k2 = jax.random.split(key)
    logits = jax.random.normal(k1, (B, T, V), dtype=jnp.float32)
    y_model = jax.nn.log_softmax(logits, axis=-1)       # log-probs, as NLLLoss expects
    y_true = jax.random.randint(k2, (B, T), 0, V, dtype=jnp.int32)

    out_sum = jax.block_until_ready(loss_fun(y_model, y_true, reduction='sum'))
    out_mean = jax.block_until_ready(loss_fun(y_model, y_true, reduction='mean'))
    ref_sum = _reference(y_model, y_true, 'sum')
    ref_mean = _reference(y_model, y_true, 'mean')
    assert jnp.allclose(out_sum, ref_sum, rtol=1e-5, atol=1e-4), (out_sum, ref_sum)
    assert jnp.allclose(out_mean, ref_mean, rtol=1e-5, atol=1e-4), (out_mean, ref_mean)

    # case 2: ragged shape (BT % 8 != 0, V % 128 != 0); exercises the in-kernel
    # row mask over a partial boundary block (no jnp.pad of the big tensor).
    B2, T2, V2 = 3, 7, 50
    k3, k4 = jax.random.split(k2)
    logits2 = jax.random.normal(k3, (B2, T2, V2), dtype=jnp.float32)
    y_model2 = jax.nn.log_softmax(logits2, axis=-1)
    y_true2 = jax.random.randint(k4, (B2, T2), 0, V2, dtype=jnp.int32)
    out2 = jax.block_until_ready(loss_fun(y_model2, y_true2, reduction='sum'))
    ref2 = _reference(y_model2, y_true2, 'sum')
    assert jnp.allclose(out2, ref2, rtol=1e-5, atol=1e-4), (out2, ref2)

    # case 3: bf16 log-probs stay bf16 into the kernel (half the HBM traffic,
    # no wrapper-side upcast copy); per-tile upcast happens inside the kernel.
    B3, T3, V3 = 4, 37, 203
    k5, k6 = jax.random.split(k4)
    logits3 = jax.random.normal(k5, (B3, T3, V3), dtype=jnp.float32)
    y_model3 = jax.nn.log_softmax(logits3, axis=-1).astype(jnp.bfloat16)
    y_true3 = jax.random.randint(k6, (B3, T3), 0, V3, dtype=jnp.int32)
    out3 = jax.block_until_ready(loss_fun(y_model3, y_true3, reduction='sum'))
    ref3 = _reference(y_model3.astype(jnp.float32), y_true3, 'sum')
    assert jnp.allclose(out3, ref3, rtol=1e-3, atol=1e-1), (out3, ref3)

    print("KERNEL_OK")
</pallas_src>

<mosaic_0001>
module attributes {stable_mosaic.version = 11 : i64} {
  func.func @kernel(%arg0: i32, %arg1: i32, %arg2: memref<16x32xf32, #tpu.memory_space<vmem>>, %arg3: memref<16x1xi32, #tpu.memory_space<vmem>>, %arg4: memref<1x1xf32, #tpu.memory_space<vmem>>, %arg5: memref<1x1xf32, #tpu.memory_space<vmem>>) attributes {dimension_semantics = [#tpu.dimension_semantics<parallel>, #tpu.dimension_semantics<arbitrary>], iteration_bounds = array<i64: 1, 1>, scalar_prefetch = 0 : i64, scratch_operands = 1 : i64, tpu.core_type = #tpu.core_type<tc>, window_params = [{transform_indices = @transform_0, window_bounds = array<i64: 16, 32>}, {transform_indices = @transform_1, window_bounds = array<i64: 16, 1>}, {transform_indices = @transform_2, window_bounds = array<i64: 1, 1>}]} {
    %c0_i32 = arith.constant 0 : i32
    %0 = arith.cmpi eq, %arg1, %c0_i32 : i32
    %1 = arith.extui %0 : i1 to i32
    %c0_i32_0 = arith.constant 0 : i32
    %2 = arith.cmpi ne, %1, %c0_i32_0 : i32
    scf.if %2 {
      %cst_12 = arith.constant 0.000000e+00 : f32
      %20 = vector.broadcast %cst_12 : f32 to vector<1x1xf32>
      %c0_13 = arith.constant 0 : index
      %c0_14 = arith.constant 0 : index
      %21 = vector.load %arg5[%c0_13, %c0_14] : memref<1x1xf32, #tpu.memory_space<vmem>>, vector<1x1xf32>
      tpu.vector_store %arg5[%c0_13, %c0_14], %20 {strides = array<i32>} : memref<1x1xf32, #tpu.memory_space<vmem>>, vector<1x1xf32>,
    } else {
    }
    %c0 = arith.constant 0 : index
    %c0_1 = arith.constant 0 : index
    %3 = vector.load %arg2[%c0, %c0_1] : memref<16x32xf32, #tpu.memory_space<vmem>>, vector<16x32xf32>
    %c0_2 = arith.constant 0 : index
    %c0_3 = arith.constant 0 : index
    %4 = vector.load %arg3[%c0_2, %c0_3] : memref<16x1xi32, #tpu.memory_space<vmem>>, vector<16x1xi32>
    %5 = tpu.iota {dimensions = array<i32: 1>} : vector<16x32xi32>
    %6 = vector.broadcast %4 : vector<16x1xi32> to vector<16x32xi32>
    %7 = arith.cmpi eq, %5, %6 : vector<16x32xi32>
    %cst = arith.constant 0.000000e+00 : f32
    %8 = vector.broadcast %cst : f32 to vector<16x32xf32>
    %9 = arith.select %7, %3, %8 : vector<16x32xi1>, vector<16x32xf32>
    %cst_4 = arith.constant dense<0.000000e+00> : vector<16xf32>
    %10 = vector.multi_reduction <add>, %9, %cst_4 [1] : vector<16x32xf32> to vector<16xf32>
    %11 = vector.shape_cast %10 : vector<16xf32> to vector<16x1xf32>
    %c0_5 = arith.constant 0 : index
    %c0_6 = arith.constant 0 : index
    %12 = vector.load %arg5[%c0_5, %c0_6] : memref<1x1xf32, #tpu.memory_space<vmem>>, vector<1x1xf32>
    %cst_7 = arith.constant dense<0.000000e+00> : vector<1xf32>
    %13 = vector.multi_reduction <add>, %11, %cst_7 [0] : vector<16x1xf32> to vector<1xf32>
    %14 = vector.shape_cast %13 : vector<1xf32> to vector<1x1xf32>
    %15 = arith.addf %12, %14 : vector<1x1xf32>
    %c0_8 = arith.constant 0 : index
    %c0_9 = arith.constant 0 : index
    %16 = vector.load %arg5[%c0_8, %c0_9] : memref<1x1xf32, #tpu.memory_space<vmem>>, vector<1x1xf32>
    tpu.vector_store %arg5[%c0_8, %c0_9], %15 {strides = array<i32>} : memref<1x1xf32, #tpu.memory_space<vmem>>, vector<1x1xf32>,
    %c0_i32_10 = arith.constant 0 : i32
    %17 = arith.cmpi eq, %arg1, %c0_i32_10 : i32
    %18 = arith.extui %17 : i1 to i32
    %c0_i32_11 = arith.constant 0 : i32
    %19 = arith.cmpi ne, %18, %c0_i32_11 : i32
    scf.if %19 {
      %c0_12 = arith.constant 0 : index
      %c0_13 = arith.constant 0 : index
      %20 = vector.load %arg5[%c0_12, %c0_13] : memref<1x1xf32, #tpu.memory_space<vmem>>, vector<1x1xf32>
      %cst_14 = arith.constant 0.000000e+00 : f32
      %21 = vector.broadcast %cst_14 : f32 to vector<1x1xf32>
      %22 = arith.subf %21, %20 : vector<1x1xf32>
      %c0_15 = arith.constant 0 : index
      %c0_16 = arith.constant 0 : index
      %23 = vector.load %arg4[%c0_15, %c0_16] : memref<1x1xf32, #tpu.memory_space<vmem>>, vector<1x1xf32>
      tpu.vector_store %arg4[%c0_15, %c0_16], %22 {strides = array<i32>} : memref<1x1xf32, #tpu.memory_space<vmem>>, vector<1x1xf32>,
    } else {
    }
    return
  }
  func.func @transform_0(%arg0: i32, %arg1: i32) -> (i32, i32) {
    %c1_i32 = arith.constant 1 : i32
    %0 = arith.muli %arg0, %c1_i32 : i32
    %1 = arith.addi %0, %arg1 : i32
    %c0_i32 = arith.constant 0 : i32
    %c0_i32_0 = arith.constant 0 : i32
    return %1, %c0_i32 : i32, i32
  }
  func.func @transform_1(%arg0: i32, %arg1: i32) -> (i32, i32) {
    %c1_i32 = arith.constant 1 : i32
    %0 = arith.muli %arg0, %c1_i32 : i32
    %1 = arith.addi %0, %arg1 : i32
    %c0_i32 = arith.constant 0 : i32
    %c0_i32_0 = arith.constant 0 : i32
    return %1, %c0_i32 : i32, i32
  }
  func.func @transform_2(%arg0: i32, %arg1: i32) -> (i32, i32) {
    %c0_i32 = arith.constant 0 : i32
    %c0_i32_0 = arith.constant 0 : i32
    return %arg0, %c0_i32 : i32, i32
  }
}

</mosaic_0001>

<bundles_post_ra>
// kernel: tpu_custom_call.1
= control target key start
LH: loop header
LB: loop body
LE: loop exit
PB: predicated region body
PF: predicated region fallthrough
CT: control target
= control target key end

     0   :  { %s201_s0 = inlined_call_operand.vmem [shape: f32[16,32], index: 0, kind: input, shape index: {}]   ;;  %s202_s1 = inlined_call_operand.vmem [shape: s32[16,1], index: 1, kind: input, shape index: {}]   ;;  %s203_s2 = inlined_call_operand.hbm [shape: f32[1,1], index: 2, kind: output, shape index: {}]  }
   0x1   :  { %v64_v0 = vld [vmem:[%s202_s1] sm:$0xff] }
   0x2   :  { %7 = vsyncpa [#allocation4], 0  ;;  %v156_v1 = vmov 0   ;;  %v65_v2 = vld [vmem:[%s202_s1 + $0x8] sm:$0xff]  ;;  %v66_v3 = vlaneseq  ;;  %v62_v5 = vld [vmem:[%s201_s0] sm:$0xff]  ;;  %vm78_vm0 = vcmask 261120  }
   0x3   :  { %131 = vset.pattern.permute.xlu0 %v156_v1  ;;  %v63_v9 = vld [vmem:[%s201_s0 + $0x8] sm:$0xff]  ;;  %vm60_vm3 = vcmask 0   ;;  %v157_v13 = vmov 0.0   ;;  %s158_s0 = smov [#allocation3]  }
   0x4   :  { %69 = vperm.xlu0 %131, %v64_v0   ;;  %v67_v4 = vand.u32 127, %v66_v3  ;;  %61 = vst.msk [vmem:[#allocation2] sm:$0x1] %vm60_vm3, %v157_v13  ;;  %s108_s1 = sshll.u32 %s158_s0, 4  ;;  %s109_s1 = int_to_ptr.vmem [resolvable:$true] %s108_s1 }
   0x5   :  { %s132_s17 = scalar_lea.vmem %s109_s1, 16  ;;  %s136_s18 = scalar_lea.vmem %s109_s1, 32 }
   0x6   :  { %p133_p0 = scmp.ne.s32.totalorder %s109_s1, %s132_s17  ;;  %p137_p1 = scmp.lt.s32.totalorder %s109_s1, %s109_s1 }
   0x7   :  { %p138_p2 = scmp.lt.s32.totalorder %s136_s18, %s132_s17 }
   0x8   :  { %72 = vperm.xlu0 %131, %v65_v2  }
   0x9   :  { %p139_p3 = por %p138_p2, %p137_p1 }
   0xb   :  { %v85_v22 = vld [vmem:[#allocation2] sm:$0x1]  ;;  %p140_p4 = pnand %p139_p3, %p133_p0 }
  0x83   :  { %v70_v6 = vpop.permute.xlu0 %69 }
  0x84   :  { %vm74_vm1 = vcmp.eq.s32.totalorder %v67_v4, %v70_v6 }
  0x85   :  { %v76_v7 = vsel %vm74_vm1, %v62_v5, 0.0 }
  0x86   :  { %v79_v8 = vsel %vm78_vm0, %v76_v7, 0.0 }
  0x87   :  { %v73_v10 = vpop.permute.xlu0 %72  ;;  %80 = vadd.xlane.f32.xlu1 %v79_v8 }
  0x88   :  { %vm75_vm2 = vcmp.eq.s32.totalorder %v67_v4, %v73_v10 }
  0x89   :  { %v77_v11 = vsel %vm75_vm2, %v63_v9, 0.0 }
  0x8a   :  { %v82_v12 = vsel %vm78_vm0, %v77_v11, 0.0 }
  0x8b   :  { %83 = vadd.xlane.f32.xlu1 %v82_v12 }
 0x114   :  { %v81_v14 = vpop.xlane.xlu1 %80 }
 0x118   :  { %v84_v15 = vpop.xlane.xlu1 %83 }
 0x119   :  { %v86_v16 = vadd.f32 %v84_v15, %v81_v14 }
 0x11b   :  { %v87_v17 = vrot.slane %v86_v16, 4 }
 0x11d   :  { %v88_v18 = vadd.f32 %v87_v17, %v86_v16 }
 0x11f   :  { %v89_v19 = vrot.slane %v88_v18, 2 }
 0x121   :  { %v90_v20 = vadd.f32 %v89_v19, %v88_v18 }
 0x123   :  { %v91_v21 = vrot.slane %v90_v20, 1 }
 0x125   :  { %v92_v23 = vadd.f32 %v91_v21, %v90_v20 }
 0x127   :  { %v93_v24 = vadd.f32 %v92_v23, %v85_v22 }
 0x129   :  { %95 = vst.msk [vmem:[#allocation2] sm:$0x1] %vm60_vm3, %v93_v24 }
 0x130   :  { %v99_v25 = vld [vmem:[#allocation2] sm:$0x1] }
 0x131   :  { %v100_v26 = vsub.f32 0.0, %v99_v25 }
 0x133   :  { %101 = vst.msk [vmem:[#allocation3] sm:$0x1] %vm60_vm3, %v100_v26 }
 0x134   :  { %143 = shalt.err (!%p140_p4)
}
 0x135   :  { %s144_s21 = scalar_lea.hbm %s203_s2, 16 }
 0x136   :  { %p145_p5 = scmp.ne.s32.totalorder %s203_s2, %s144_s21  ;;  %p148_p6 = scmp.lt.u32.totalorder %s144_s21, %s203_s2 }
 0x138   :  { %p150_p7 = pnand %p148_p6, %p145_p5 }
 0x13a   :  { %153 = shalt.err (!%p150_p7)
}
 0x13b   :  { %111 = dma.vmem_to_hbm [thread:$0]  %s109_s1, 16, %s203_s2, [#allocation4]  }
 0x13c   :  { %154 = dma.done.wait [#allocation4], 16  }
 0x13d   :  { %155 = vsyncadd [#allocation4], 4294967280 }
 0x13e   :  { %115 = vsyncpa [#allocation4], 1 }

</bundles_post_ra>
